<compile_context>
chip_gen: v7x
topology: tpu7x:2x2x1
jax: 0.10.0
libtpu: 0.0.40
codegen_flags: <defaults>
</compile_context>

<pallas_src>
import jax
import jax.numpy as jnp
from jax import lax
from jax.experimental import pallas as pl
from jax.experimental.pallas import tpu as pltpu


_VMEM_BLOCK_BUDGET = 24 * 1024 * 1024   # target bytes for double-buffered blocks
_VMEM_LIMIT_BYTES = 48 * 1024 * 1024    # scoped-VMEM limit used only when blocks
                                        # are big (< v7x's 64 MiB physical VMEM)


def _round_up(x, m):
    return ((x + m - 1) // m) * m


def _patch_proj_kernel(p_ref, w_ref, b_ref, o_ref):
    # p_ref: (tm, Kg) patch rows; w_ref: (Kg, tn) weight (canonical MXU feed);
    # b_ref: (1, tn) bias; o_ref: (tm, tn) output tile.
    acc = jnp.dot(p_ref[...], w_ref[...], preferred_element_type=jnp.float32)
    o_ref[...] = (acc + b_ref[...]).astype(o_ref.dtype)


def patch_embed_forward(x, weight, bias, patch_size, compute_dtype=None):
    """x: (B, C, H, W); weight: (E, C, ph, pw); bias: (E,). Returns (B, N, E)."""
    B, C, H, W = x.shape
    ph, pw = patch_size
    E = weight.shape[0]
    Gh, Gw = H // ph, W // pw
    N = Gh * Gw
    K = C * ph * pw
    M = B * N
    out_dtype = x.dtype

    # Conv2d "VALID" truncation when H/W are not multiples of the patch size.
    if H != Gh * ph or W != Gw * pw:
        x = x[:, :, : Gh * ph, : Gw * pw]

    if compute_dtype is not None:        # optional bf16 trade-off (off by default)
        x = x.astype(compute_dtype)
        weight = weight.astype(compute_dtype)

    # --- patchify: pure reshape/transpose.  allow_input_fusion below lets XLA
    # feed it straight into the kernel's input stream instead of a full HBM
    # round trip of the patch matrix.
    # TODO(synk): verify in HLO/xprof that the 6-D transpose actually fuses; if
    # not, switch to an NHWC/(ph,pw,C)-ordered layout or an in-kernel patchify
    # DMA (memory_space=pl.ANY + make_async_copy) for wide contiguous transfers.
    patches = x.reshape(B, C, Gh, ph, Gw, pw)
    patches = patches.transpose(0, 2, 4, 1, 3, 5).reshape(M, K)

    # One-time weight relayout to the canonical (K, E) MXU feed; the (C, ph, pw)
    # flatten order matches the patch K-axis order above.
    w_mat = jnp.transpose(weight.reshape(E, K))          # (K, E)
    b_row = bias.reshape(1, E)

    # --- lane-dense grouping for narrow embeddings (E < 128) ----------------
    # The row-major (M, E) output is contiguous, so (M, E) == (M//g, g*E) as a
    # free view.  Multiplying g-row patch groups against a block-diagonal
    # weight makes both the patch loads and (crucially) the output stores full
    # 128-lane accesses instead of masked partial stores.
    g = 1
    if E < 128 and 128 % E == 0:
        g_cand = 128 // E
        if M % g_cand == 0 and g_cand * K <= 2048:       # bound extra MXU work
            g = g_cand
    if g > 1:
        Mg, Kg, Eg = M // g, g * K, g * E
        patches = patches.reshape(Mg, Kg)                          # free view
        w_mat = jnp.kron(jnp.eye(g, dtype=w_mat.dtype), w_mat)     # block-diag (Kg, Eg)
        b_row = jnp.tile(b_row, (1, g))                            # (1, Eg)
    else:
        Mg, Kg, Eg = M, K, E

    p_elt = jnp.dtype(patches.dtype).itemsize
    w_elt = jnp.dtype(w_mat.dtype).itemsize
    o_elt = jnp.dtype(out_dtype).itemsize

    # --- embedding-dim tiling: keep the weight fully resident (constant index
    # map -> fetched once) unless it alone would blow the block budget.
    w_bytes = 2 * Kg * Eg * w_elt
    if w_bytes <= _VMEM_BLOCK_BUDGET // 2 or Eg < 256:
        tn, num_n = Eg, 1
    else:
        tn = None
        t = (Eg // 128) * 128
        while t >= 128:
            if Eg % t == 0 and 2 * Kg * t * w_elt <= _VMEM_BLOCK_BUDGET // 2:
                tn = t
                break
            t -= 128
        if tn is None:
            tn = 256                    # ragged last E block; Pallas masks OOB
        num_n = pl.cdiv(Eg, tn)

    # --- row tiling: size the patch block in bytes (>= ~1 MiB) and cap with a
    # K-aware VMEM budget so big-K configs stay within v7x's 64 MiB VMEM.
    budget_left = _VMEM_BLOCK_BUDGET - 2 * Kg * tn * w_elt - 2 * tn * w_elt
    per_row = 2 * Kg * p_elt + 2 * tn * o_elt
    tm_cap = max(8, (budget_left // per_row) // 8 * 8)
    tm = _round_up(max(1, (1 << 20) // max(1, Kg * p_elt)), 8)
    tm = max(8, min(tm, tm_cap))
    if tm >= Mg:
        tm = Mg                         # single block covers all rows
        if num_n == 1 and Mg >= 16:
            # v7x has two TensorCores: give the "parallel" grid >= 2 blocks.
            tm = _round_up(-(-Mg // 2), 8)
    num_m = pl.cdiv(Mg, tm)

    # --- grid order: if E had to be tiled, pick the order with the smaller
    # redundant HBM traffic (weight re-read num_m times vs patches num_n times).
    n_inner = True
    if num_n > 1:
        n_inner = num_m * Kg * Eg * w_elt <= num_n * Mg * Kg * p_elt

    if n_inner:
        grid = (num_m, num_n)
        p_map = lambda i, j: (i, 0)
        w_map = lambda i, j: (0, j)
        b_map = lambda i, j: (0, j)
        o_map = lambda i, j: (i, j)
    else:
        grid = (num_n, num_m)
        p_map = lambda j, i: (i, 0)
        w_map = lambda j, i: (0, j)
        b_map = lambda j, i: (0, j)
        o_map = lambda j, i: (i, j)

    est_bytes = (2 * tm * Kg * p_elt + 2 * Kg * tn * w_elt
                 + 2 * tn * w_elt + 2 * tm * tn * o_elt)
    vmem_limit = _VMEM_LIMIT_BYTES if est_bytes > 12 * 1024 * 1024 else None

    out = pl.pallas_call(
        _patch_proj_kernel,
        out_shape=jax.ShapeDtypeStruct((Mg, Eg), out_dtype),
        grid_spec=pltpu.PrefetchScalarGridSpec(
            num_scalar_prefetch=0,
            grid=grid,
            in_specs=[
                pl.BlockSpec((tm, Kg), p_map),   # patch rows (ragged M masked)
                pl.BlockSpec((Kg, tn), w_map),   # weight, canonical (K, E) feed
                pl.BlockSpec((1, tn), b_map),    # bias row
            ],
            out_specs=pl.BlockSpec((tm, tn), o_map),
        ),
        compiler_params=pltpu.CompilerParams(
            dimension_semantics=("parallel", "parallel"),
            # Let XLA fold the patchify transpose into the kernel's input DMA.
            allow_input_fusion=[True, False, False],
            vmem_limit_bytes=vmem_limit,
        ),
    )(patches, w_mat, b_row)

    # (Mg, Eg) -> (M, E) -> (B, N, E): free row-major views.
    return out.reshape(B, N, E)


def _reference(x, weight, bias, patch_size):
    # Pure-JAX reference: strided conv (== patchify + matmul), then
    # flatten(2).transpose(1, 2) — identical to the PyTorch module forward.
    y = lax.conv_general_dilated(
        x, weight, window_strides=patch_size, padding="VALID",
        dimension_numbers=("NCHW", "OIHW", "NCHW"),
        precision=lax.Precision.HIGHEST,
    ) + bias.reshape(1, -1, 1, 1)
    B, E, Gh, Gw = y.shape
    return y.reshape(B, E, Gh * Gw).transpose(0, 2, 1)


if __name__ == "__main__":
    # Module-consistent small shapes: img_size=16, patch_size=(1, 4),
    # in_chans=4, embed_dim=32, flatten=True, norm_layer=None (Identity).
    B, C, H, W = 2, 4, 16, 16
    patch_size = (1, 4)
    E = 32

    key = jax.random.PRNGKey(0)
    kx, kw, kb = jax.random.split(key, 3)
    x = jax.random.normal(kx, (B, C, H, W), dtype=jnp.float32)
    weight = jax.random.normal(kw, (E, C, patch_size[0], patch_size[1]),
                               dtype=jnp.float32) * 0.02
    bias = jax.random.normal(kb, (E,), dtype=jnp.float32) * 0.02

    fwd = jax.jit(patch_embed_forward,
                  static_argnames=("patch_size", "compute_dtype"))
    out = jax.block_until_ready(fwd(x, weight, bias, patch_size=patch_size))

    ref = _reference(x, weight, bias, patch_size)
    N = (H // patch_size[0]) * (W // patch_size[1])
    assert out.shape == ref.shape == (B, N, E)
    err = float(jnp.max(jnp.abs(out - ref)))
    assert err < 1e-3, f"max abs err {err}"

    print("KERNEL_OK")
</pallas_src>

<mosaic_0001>
module attributes {stable_mosaic.version = 11 : i64} {
  func.func @_patch_proj_kernel(%arg0: i32, %arg1: i32, %arg2: memref<16x64xf32, #tpu.memory_space<vmem>>, %arg3: memref<64x128xf32, #tpu.memory_space<vmem>>, %arg4: memref<1x128xf32, #tpu.memory_space<vmem>>, %arg5: memref<16x128xf32, #tpu.memory_space<vmem>>) attributes {dimension_semantics = [#tpu.dimension_semantics<parallel>, #tpu.dimension_semantics<parallel>], iteration_bounds = array<i64: 2, 1>, scalar_prefetch = 0 : i64, scratch_operands = 0 : i64, tpu.core_type = #tpu.core_type<tc>, window_params = [{transform_indices = @transform_0, window_bounds = array<i64: 16, 64>}, {transform_indices = @transform_1, window_bounds = array<i64: 64, 128>}, {transform_indices = @transform_2, window_bounds = array<i64: 1, 128>}, {transform_indices = @transform_3, window_bounds = array<i64: 16, 128>}]} {
    %c0 = arith.constant 0 : index
    %c0_0 = arith.constant 0 : index
    %0 = vector.load %arg2[%c0, %c0_0] : memref<16x64xf32, #tpu.memory_space<vmem>>, vector<16x64xf32>
    %c0_1 = arith.constant 0 : index
    %c0_2 = arith.constant 0 : index
    %1 = vector.load %arg3[%c0_1, %c0_2] : memref<64x128xf32, #tpu.memory_space<vmem>>, vector<64x128xf32>
    %cst = arith.constant dense<0.000000e+00> : vector<16x128xf32>
    %2 = tpu.matmul %0, %1, %cst {dimension_numbers = #tpu.dot_dimension_numbers<[1], [0], [0], [1], [0, 0, 1, 1], [], []>} : vector<16x64xf32>, vector<64x128xf32>, vector<16x128xf32> -> vector<16x128xf32>
    %c0_3 = arith.constant 0 : index
    %c0_4 = arith.constant 0 : index
    %3 = vector.load %arg4[%c0_3, %c0_4] : memref<1x128xf32, #tpu.memory_space<vmem>>, vector<1x128xf32>
    %4 = vector.broadcast %3 : vector<1x128xf32> to vector<16x128xf32>
    %5 = arith.addf %2, %4 : vector<16x128xf32>
    %c0_5 = arith.constant 0 : index
    %c0_6 = arith.constant 0 : index
    %6 = vector.load %arg5[%c0_5, %c0_6] : memref<16x128xf32, #tpu.memory_space<vmem>>, vector<16x128xf32>
    tpu.vector_store %arg5[%c0_5, %c0_6], %5 {strides = array<i32>} : memref<16x128xf32, #tpu.memory_space<vmem>>, vector<16x128xf32>,
    return
  }
  func.func @transform_0(%arg0: i32, %arg1: i32) -> (i32, i32) {
    %c0_i32 = arith.constant 0 : i32
    %c0_i32_0 = arith.constant 0 : i32
    return %arg0, %c0_i32 : i32, i32
  }
  func.func @transform_1(%arg0: i32, %arg1: i32) -> (i32, i32) {
    %c0_i32 = arith.constant 0 : i32
    %c0_i32_0 = arith.constant 0 : i32
    return %c0_i32, %arg1 : i32, i32
  }
  func.func @transform_2(%arg0: i32, %arg1: i32) -> (i32, i32) {
    %c0_i32 = arith.constant 0 : i32
    %c0_i32_0 = arith.constant 0 : i32
    return %c0_i32, %arg1 : i32, i32
  }
  func.func @transform_3(%arg0: i32, %arg1: i32) -> (i32, i32) {
    %c0_i32 = arith.constant 0 : i32
    return %arg0, %arg1 : i32, i32
  }
}

</mosaic_0001>

<bundles_post_ra>
// kernel: patch_embed_forward.1
= control target key start
LH: loop header
LB: loop body
LE: loop exit
PB: predicated region body
PF: predicated region fallthrough
CT: control target
= control target key end

     0   :  { %s557_s12 = smov 0   ;;  %s559_s13 = smov 0   ;;  %s617_s0 = inlined_call_operand.vmem [shape: f32[32,64], index: 0, kind: input, shape index: {}]   ;;  %s618_s1 = inlined_call_operand.vmem [shape: f32[64,128], index: 1, kind: input, shape index: {}]   ;;  %s619_s2 = inlined_call_operand.vmem [shape: f32[1,128], index: 2, kind: input, shape index: {}]   ;;  %s620_s3 = inlined_call_operand.vmem [shape: f32[32,128], index: 3, kind: output, shape index: {}]  }
   0x1   :  { %s561_s14 = smov 0  }
   0x2 LB: > { %s25_s15 = sadd.s32 1, %s531_s13  ;;  %p434_p0 = scmp.ge.s32.totalorder %s535_s14, 1  ;;  %s535_s14 = sphi %s561_s14, %s13_s14   ;;  %s531_s13 = sphi %s559_s13, %s622_s13   ;;  %s527_s12 = sphi %s557_s12, %s621_s12  }
   0x3   : > { %p27_p1 = scmp.ge.s32.totalorder %s25_s15, 2  ;;  %p169_p2 = scmp.lt.s32.totalorder %s535_s14, 3 }
   0x5   : > { %s624_s15 = smov (%p27_p1, %s25_s15), 0  ;;  %p170_p3 = pnand %p434_p0, %p169_p2 }
   0x6   : > { %v227_v0 = vld [vmem:[%s618_s1] sm:$0xff] (!%p170_p3)  ;;  %v228_v1 = vld [vmem:[%s618_s1 + $0x8] sm:$0xff] (!%p170_p3)  ;;  %v229_v2 = vld [vmem:[%s618_s1 + $0x10] sm:$0xff] (!%p170_p3)  ;;  %s435_s22 = sshll.u32 (!%p170_p3), %s527_s12, 1  ;;  %vm242_vm0 = vcmask (!%p170_p3), 523264  }
   0x7   : > { %173 = sbr.rel (%p170_p3) target bundleno = 241 (0xf1), region = 32  ;;  %v473_v3 = vpack.c.bf16 (!%p170_p3), %v228_v1, %v227_v0  ;;  %v230_v4 = vld [vmem:[%s618_s1 + $0x18] sm:$0xff] (!%p170_p3)  ;;  %p204_p4 = scmp.lt.s32.totalorder (!%p170_p3), %s435_s22, 3  ;;  %v231_v6 = vld [vmem:[%s618_s1 + $0x20] sm:$0xff] (!%p170_p3)  ;;  %v232_v7 = vld [vmem:[%s618_s1 + $0x28] sm:$0xff] (!%p170_p3) }
   0x8   : > { %v477_v5 = vpack.c.bf16 (!%p170_p3), %v230_v4, %v229_v2  ;;  %v481_v8 = vpack.c.bf16 (!%p170_p3), %v232_v7, %v231_v6  ;;  %v233_v9 = vld [vmem:[%s618_s1 + $0x30] sm:$0xff] (!%p170_p3)  ;;  %v234_v10 = vld [vmem:[%s618_s1 + $0x38] sm:$0xff] (!%p170_p3)  ;;  %v439_v14 = vld [vmem:[%s619_s2] ss:$0 sm:$0xff] (!%p170_p3) }
   0x9   : > { %474 = vmatprep.subr.bf16.mxu0 (!%p170_p3), %v473_v3  ;;  %v485_v12 = vpack.c.bf16 (!%p170_p3), %v234_v10, %v233_v9 }
   0xa   : > { %476 = vmatpush3.bf16.msra.mxu0 (!%p170_p3), %v473_v3 }
   0xb   : > { %478 = vmatprep.subr.bf16.mxu0 (!%p170_p3), %v477_v5 }
   0xe   : > { %s626_s22 = smov (!%p204_p4, %s435_s22), 3  ;;  %480 = vmatpush3.bf16.msra.mxu0 %v477_v5 }
   0xf   : > { %s436_s29 = sshll.u32 %s626_s22, 3  ;;  %482 = vmatprep.subr.bf16.mxu0 %v481_v8 }
  0x10   : > { %s207_s9 = scalar_lea.vmem %s617_s0, %s436_s29  ;;  %s223_s17 = scalar_lea.vmem %s620_s3, %s436_s29 }
  0x11   : > { %v225_v11 = vld [vmem:[%s207_s9] sm:$0xff]  ;;  %v226_v13 = vld [vmem:[%s207_s9 + $0x8] sm:$0xff] }
  0x12   : > { %470 = vmatprep.mubr.msk.f32.mxu0 %vm242_vm0, %v225_v11  ;;  %484 = vmatpush3.bf16.msra.mxu0 %v481_v8 }
  0x13   : > { %486 = vmatprep.subr.bf16.mxu0 %v485_v12 }
  0x16   : > { %488 = vmatpush3.bf16.msra.mxu0 %v485_v12 }
  0x19   : > { %471 = vmatmul.mubr.msk.f32.vlgmr.msra.gmra.mrb[0].mxu0 %vm242_vm0, %v226_v13 }
  0xec   : > { %v472_v15 = vpop.f32.mrb[0].mxu0 }
  0xed   : > { %v315_v16 = vpop.f32.mrb[1].mxu0  ;;  %v321_v18 = vadd.f32 %v472_v15, %v439_v14 }
  0xee   : > { %v316_v17 = vadd.f32 %v439_v14, %v315_v16 }
  0xef   : > { %325 = vst [vmem:[%s223_s17 + $0x8] sm:$0xff] %v321_v18 }
  0xf0   : > { %324 = vst [vmem:[%s223_s17] sm:$0xff] %v316_v17 }
  0xf1 PF: > { %s13_s14 = sadd.s32 1, %s535_s14   ;;  %s621_s12 = smov %s531_s13 }
  0xf2   : > { %p10_p5 = scmp.ge.s32.totalorder %s13_s14, 4   ;;  %s622_s13 = smov %s624_s15 }
  0xf4   :  { %12 = sbr.rel (!%p10_p5) target bundleno = 2 (0x2), region = 68 }

</bundles_post_ra>
